<compile_context>
chip_gen: v7x
topology: tpu7x:2x2x1
jax: 0.10.0
libtpu: 0.0.40
codegen_flags: <defaults>
</compile_context>

<pallas_src>
import jax
import jax.numpy as jnp
from jax.experimental import pallas as pl
from jax.experimental.pallas import tpu as pltpu

_LANE = 128
_STRIP_LANES = 1024            # inner column-strip width (lanes), multiple of 128
_TEMP_BYTES = 2 * 1024 * 1024  # cap on per-strip f32 temporaries (bounds vreg/VMEM pressure)


def _round_up(x, m):
    return ((x + m - 1) // m) * m


def _cdiv(a, b):
    return (a + b - 1) // b


def _sublane_multiple(*dtypes):
    """Native sublane packing: 8 rows for 32-bit, 16 for bf16/fp16, 32 for int8/fp8."""
    sub = 8
    for dt in dtypes:
        sub = max(sub, 32 // max(jnp.dtype(dt).itemsize, 1))
    return sub


def _block_params():
    """(per-input block bytes, vmem limit bytes), sized to the local TPU generation."""
    try:
        vmem = pltpu.get_tpu_info().vmem_capacity_bytes
    except Exception:
        vmem = None
    if vmem is None or vmem <= 64 * 1024 * 1024:
        # v7x-class (64 MiB VMEM/TC) or unknown: conservative sizing that still
        # amortizes the ~0.35 us/step pipeline overhead at 3.2 TB/s.
        return 4 * 1024 * 1024, 40 * 1024 * 1024
    # v5e / v6e (128 MiB VMEM): bigger blocks, still well under the limit
    # (2 inputs x 2 pipeline buffers x 8 MiB = 32 MiB of buffering).
    return 8 * 1024 * 1024, 48 * 1024 * 1024


def _make_dice_sums_kernel(tr, td, strip, d_valid, need_mask):
    """Kernel accumulating per-row sum(x*t) and sum(x+t) over (tr, td) tiles."""
    n_strips = td // strip
    lane_groups = strip // _LANE

    def _strip_body(masked, k, x_ref, t_ref, acc_i, acc_d):
        def body(s, carry):
            start = s * strip
            if not isinstance(start, int):
                start = pl.multiple_of(start, _LANE)
            # Cast after the DMA so narrow dtypes (e.g. bf16) stream at native width.
            x = x_ref[:, pl.ds(start, strip)].astype(jnp.float32)
            t = t_ref[:, pl.ds(start, strip)].astype(jnp.float32)
            if masked:
                # Only the last column block can be ragged; zero out garbage lanes.
                col = (k * td + start
                       + jax.lax.broadcasted_iota(jnp.int32, (tr, strip), 1))
                valid = col < d_valid
                x = jnp.where(valid, x, 0.0)
                t = jnp.where(valid, t, 0.0)
            # Lane-group accumulation: 128-lane slices are vreg-aligned, so the
            # per-strip work is pure VALU adds (no XLU cross-lane reduce here).
            pi = x[:, 0:_LANE] * t[:, 0:_LANE]
            pd = x[:, 0:_LANE] + t[:, 0:_LANE]
            for g in range(1, lane_groups):
                xs = x[:, g * _LANE:(g + 1) * _LANE]
                ts = t[:, g * _LANE:(g + 1) * _LANE]
                pi = pi + xs * ts
                pd = pd + (xs + ts)
            acc_i[...] += pi
            acc_d[...] += pd
            return carry
        return body

    def kernel(x_ref, t_ref, inter_ref, den_ref, acc_i, acc_d):
        k = pl.program_id(1)
        n_k = pl.num_programs(1)

        @pl.when(k == 0)
        def _():
            acc_i[...] = jnp.zeros_like(acc_i)
            acc_d[...] = jnp.zeros_like(acc_d)

        def run(masked):
            body = _strip_body(masked, k, x_ref, t_ref, acc_i, acc_d)
            if n_strips == 1:
                body(0, 0)
            else:
                jax.lax.fori_loop(0, n_strips, body, 0, unroll=n_strips <= 8)

        if need_mask:
            # Mask only the last (ragged) column block; full blocks stay mask-free.
            @pl.when(k < n_k - 1)
            def _():
                run(False)

            @pl.when(k == n_k - 1)
            def _():
                run(True)
        else:
            run(False)

        @pl.when(k == n_k - 1)
        def _():
            # Single cross-lane reduce per row block, then lane-1-wide store once.
            inter_ref[...] = jnp.sum(acc_i[...], axis=1, keepdims=True)
            den_ref[...] = jnp.sum(acc_d[...], axis=1, keepdims=True)

    return kernel


def _row_sums(x, t):
    """Per-row sum(x*t) and sum(x)+sum(t) for 2-D (rows, d) arrays (no padding copies)."""
    r, d = x.shape
    itemsize = max(jnp.dtype(x.dtype).itemsize, jnp.dtype(t.dtype).itemsize)
    sub = _sublane_multiple(x.dtype, t.dtype)
    block_bytes, vmem_limit = _block_params()

    # --- column tile: large, multiple of the strip width, balanced across blocks.
    d_aligned = _round_up(d, _LANE)
    if d_aligned <= _STRIP_LANES:
        td = d_aligned
        strip = td
    else:
        max_td = max(_STRIP_LANES,
                     (block_bytes // (sub * itemsize)) // _STRIP_LANES * _STRIP_LANES)
        n_col = _cdiv(d_aligned, max_td)
        td = min(max_td, _round_up(_cdiv(d_aligned, n_col), _STRIP_LANES))
        strip = _STRIP_LANES

    # --- row tile: fill the block budget, bounded by strip-temp footprint.
    max_tr = max(sub, (block_bytes // (td * itemsize)) // sub * sub)
    tr_temp_cap = max(sub, (_TEMP_BYTES // (strip * 4)) // sub * sub)
    tr = min(_round_up(r, sub), max_tr, tr_temp_cap)
    # Keep >= 2 row blocks when possible so the "parallel" row axis can shard
    # across both TensorCores on v7x.
    if _cdiv(r, tr) < 2 and r > sub:
        tr = min(tr, _round_up(_cdiv(r, 2), sub))

    grid = (_cdiv(r, tr), _cdiv(d, td))
    need_mask = (d % td) != 0

    kernel = _make_dice_sums_kernel(tr, td, strip, d, need_mask)

    inter, den = pl.pallas_call(
        kernel,
        out_shape=(
            jax.ShapeDtypeStruct((r, 1), jnp.float32),
            jax.ShapeDtypeStruct((r, 1), jnp.float32),
        ),
        grid_spec=pltpu.PrefetchScalarGridSpec(
            num_scalar_prefetch=0,
            grid=grid,
            in_specs=[
                pl.BlockSpec((tr, td), lambda i, k: (i, k)),
                pl.BlockSpec((tr, td), lambda i, k: (i, k)),
            ],
            out_specs=[
                pl.BlockSpec((tr, 1), lambda i, k: (i, 0)),
                pl.BlockSpec((tr, 1), lambda i, k: (i, 0)),
            ],
            scratch_shapes=[
                pltpu.VMEM((tr, _LANE), jnp.float32),
                pltpu.VMEM((tr, _LANE), jnp.float32),
            ],
        ),
        compiler_params=pltpu.CompilerParams(
            # Row axis parallel (megacore sharding on v7x); reduction axis is
            # last and arbitrary so the accumulators stay resident across it.
            dimension_semantics=("parallel", "arbitrary"),
            vmem_limit_bytes=vmem_limit,
        ),
    )(x, t)

    return inter[:, 0], den[:, 0]


def multiclass_dice_loss(inp, target, weights=None):
    """MulticlassDiceLoss forward: inp/target (N, C, ...) -> scalar float32."""
    assert inp.shape == target.shape, (inp.shape, target.shape)
    assert inp.ndim >= 2
    n, c = inp.shape[0], inp.shape[1]
    d = 1
    for s in inp.shape[2:]:
        d *= s

    rows = n * c
    xf = inp.reshape(rows, d)
    tf = target.reshape(rows, d)

    inter, den = _row_sums(xf, tf)
    inter = inter.reshape(n, c)
    den = den.reshape(n, c)

    # NOTE: matches the given PyTorch module exactly: 2*(inter + smooth)/(den + smooth).
    smooth = jnp.float32(1.0)
    dice = 2.0 * (inter + smooth) / (den + smooth)              # (N, C)
    per_class = 1.0 - jnp.sum(dice, axis=0) / jnp.float32(n)    # (C,)
    if weights is not None:
        per_class = per_class * jnp.asarray(weights, jnp.float32)
    return jnp.sum(per_class)


def _multiclass_dice_loss_ref(inp, target, weights=None):
    """Pure-JAX mirror of the PyTorch MulticlassDiceLoss forward."""
    n, c = target.shape[0], target.shape[1]
    smooth = 1.0
    total = jnp.float32(0.0)
    for i in range(c):
        xf = inp[:, i].reshape(n, -1).astype(jnp.float32)
        tf = target[:, i].reshape(n, -1).astype(jnp.float32)
        inter = (xf * tf).sum(axis=1)
        dice = 2.0 * (inter + smooth) / (xf.sum(axis=1) + tf.sum(axis=1) + smooth)
        loss = 1.0 - dice.sum() / n
        if weights is not None:
            loss = loss * weights[i]
        total = total + loss
    return total


if __name__ == "__main__":
    key = jax.random.PRNGKey(0)
    k1, k2, k3, k4 = jax.random.split(key, 4)

    # Primary check: (N, C, H, W) = (2, 4, 16, 16), no class weights.
    # rows = 8, d = 256 -> lane-aligned, unmasked fast path.
    N, C, H, W = 2, 4, 16, 16
    inp = jax.random.uniform(k1, (N, C, H, W), dtype=jnp.float32)   # post-sigmoid-ish
    target = (jax.random.uniform(k2, (N, C, H, W)) > 0.5).astype(jnp.float32)

    loss = jax.block_until_ready(multiclass_dice_loss(inp, target))
    ref = _multiclass_dice_loss_ref(inp, target)
    assert jnp.allclose(loss, ref, atol=1e-5, rtol=1e-5), (loss, ref)

    # Secondary check: ragged rows (6) and ragged lanes (64) + class weights ->
    # exercises the clipped row block and the in-kernel column mask.
    N2, C2, H2, W2 = 2, 3, 8, 8
    inp2 = jax.random.uniform(k3, (N2, C2, H2, W2), dtype=jnp.float32)
    target2 = (jax.random.uniform(k4, (N2, C2, H2, W2)) > 0.5).astype(jnp.float32)
    weights = jnp.array([0.5, 1.0, 2.0], dtype=jnp.float32)

    loss2 = jax.block_until_ready(multiclass_dice_loss(inp2, target2, weights))
    ref2 = _multiclass_dice_loss_ref(inp2, target2, weights)
    assert jnp.allclose(loss2, ref2, atol=1e-5, rtol=1e-5), (loss2, ref2)

    print("KERNEL_OK")
</pallas_src>

<mosaic_0001>
module attributes {stable_mosaic.version = 11 : i64} {
  func.func @kernel(%arg0: i32, %arg1: i32, %arg2: memref<8x256xf32, #tpu.memory_space<vmem>>, %arg3: memref<8x256xf32, #tpu.memory_space<vmem>>, %arg4: memref<8x1xf32, #tpu.memory_space<vmem>>, %arg5: memref<8x1xf32, #tpu.memory_space<vmem>>, %arg6: memref<8x128xf32, #tpu.memory_space<vmem>>, %arg7: memref<8x128xf32, #tpu.memory_space<vmem>>) attributes {dimension_semantics = [#tpu.dimension_semantics<parallel>, #tpu.dimension_semantics<arbitrary>], iteration_bounds = array<i64: 1, 1>, scalar_prefetch = 0 : i64, scratch_operands = 2 : i64, tpu.core_type = #tpu.core_type<tc>, window_params = [{transform_indices = @transform_0, window_bounds = array<i64: 8, 256>}, {transform_indices = @transform_1, window_bounds = array<i64: 8, 256>}, {transform_indices = @transform_2, window_bounds = array<i64: 8, 1>}, {transform_indices = @transform_3, window_bounds = array<i64: 8, 1>}]} {
    %c0_i32 = arith.constant 0 : i32
    %0 = arith.cmpi eq, %arg1, %c0_i32 : i32
    %1 = arith.extui %0 : i1 to i32
    %c0_i32_0 = arith.constant 0 : i32
    %2 = arith.cmpi ne, %1, %c0_i32_0 : i32
    scf.if %2 {
      %cst = arith.constant 0.000000e+00 : f32
      %26 = vector.broadcast %cst : f32 to vector<8x128xf32>
      %c0_14 = arith.constant 0 : index
      %c0_15 = arith.constant 0 : index
      %27 = vector.load %arg6[%c0_14, %c0_15] : memref<8x128xf32, #tpu.memory_space<vmem>>, vector<8x128xf32>
      tpu.vector_store %arg6[%c0_14, %c0_15], %26 {strides = array<i32>} : memref<8x128xf32, #tpu.memory_space<vmem>>, vector<8x128xf32>,
      %cst_16 = arith.constant 0.000000e+00 : f32
      %28 = vector.broadcast %cst_16 : f32 to vector<8x128xf32>
      %c0_17 = arith.constant 0 : index
      %c0_18 = arith.constant 0 : index
      %29 = vector.load %arg7[%c0_17, %c0_18] : memref<8x128xf32, #tpu.memory_space<vmem>>, vector<8x128xf32>
      tpu.vector_store %arg7[%c0_17, %c0_18], %28 {strides = array<i32>} : memref<8x128xf32, #tpu.memory_space<vmem>>, vector<8x128xf32>,
    } else {
    }
    %c0 = arith.constant 0 : index
    %c0_1 = arith.constant 0 : index
    %3 = vector.load %arg2[%c0, %c0_1] : memref<8x256xf32, #tpu.memory_space<vmem>>, vector<8x256xf32>
    %c0_2 = arith.constant 0 : index
    %c0_3 = arith.constant 0 : index
    %4 = vector.load %arg3[%c0_2, %c0_3] : memref<8x256xf32, #tpu.memory_space<vmem>>, vector<8x256xf32>
    %5 = vector.extract_strided_slice %3 {offsets = [0, 0], sizes = [8, 128], strides = [1, 1]} : vector<8x256xf32> to vector<8x128xf32>
    %6 = vector.extract_strided_slice %4 {offsets = [0, 0], sizes = [8, 128], strides = [1, 1]} : vector<8x256xf32> to vector<8x128xf32>
    %7 = arith.mulf %5, %6 : vector<8x128xf32>
    %8 = vector.extract_strided_slice %3 {offsets = [0, 0], sizes = [8, 128], strides = [1, 1]} : vector<8x256xf32> to vector<8x128xf32>
    %9 = vector.extract_strided_slice %4 {offsets = [0, 0], sizes = [8, 128], strides = [1, 1]} : vector<8x256xf32> to vector<8x128xf32>
    %10 = arith.addf %8, %9 : vector<8x128xf32>
    %11 = vector.extract_strided_slice %3 {offsets = [0, 128], sizes = [8, 128], strides = [1, 1]} : vector<8x256xf32> to vector<8x128xf32>
    %12 = vector.extract_strided_slice %4 {offsets = [0, 128], sizes = [8, 128], strides = [1, 1]} : vector<8x256xf32> to vector<8x128xf32>
    %13 = arith.mulf %11, %12 : vector<8x128xf32>
    %14 = arith.addf %7, %13 : vector<8x128xf32>
    %15 = arith.addf %11, %12 : vector<8x128xf32>
    %16 = arith.addf %10, %15 : vector<8x128xf32>
    %c0_4 = arith.constant 0 : index
    %c0_5 = arith.constant 0 : index
    %17 = vector.load %arg6[%c0_4, %c0_5] : memref<8x128xf32, #tpu.memory_space<vmem>>, vector<8x128xf32>
    %18 = arith.addf %17, %14 : vector<8x128xf32>
    %c0_6 = arith.constant 0 : index
    %c0_7 = arith.constant 0 : index
    %19 = vector.load %arg6[%c0_6, %c0_7] : memref<8x128xf32, #tpu.memory_space<vmem>>, vector<8x128xf32>
    tpu.vector_store %arg6[%c0_6, %c0_7], %18 {strides = array<i32>} : memref<8x128xf32, #tpu.memory_space<vmem>>, vector<8x128xf32>,
    %c0_8 = arith.constant 0 : index
    %c0_9 = arith.constant 0 : index
    %20 = vector.load %arg7[%c0_8, %c0_9] : memref<8x128xf32, #tpu.memory_space<vmem>>, vector<8x128xf32>
    %21 = arith.addf %20, %16 : vector<8x128xf32>
    %c0_10 = arith.constant 0 : index
    %c0_11 = arith.constant 0 : index
    %22 = vector.load %arg7[%c0_10, %c0_11] : memref<8x128xf32, #tpu.memory_space<vmem>>, vector<8x128xf32>
    tpu.vector_store %arg7[%c0_10, %c0_11], %21 {strides = array<i32>} : memref<8x128xf32, #tpu.memory_space<vmem>>, vector<8x128xf32>,
    %c0_i32_12 = arith.constant 0 : i32
    %23 = arith.cmpi eq, %arg1, %c0_i32_12 : i32
    %24 = arith.extui %23 : i1 to i32
    %c0_i32_13 = arith.constant 0 : i32
    %25 = arith.cmpi ne, %24, %c0_i32_13 : i32
    scf.if %25 {
      %c0_14 = arith.constant 0 : index
      %c0_15 = arith.constant 0 : index
      %26 = vector.load %arg6[%c0_14, %c0_15] : memref<8x128xf32, #tpu.memory_space<vmem>>, vector<8x128xf32>
      %cst = arith.constant dense<0.000000e+00> : vector<8xf32>
      %27 = vector.multi_reduction <add>, %26, %cst [1] : vector<8x128xf32> to vector<8xf32>
      %28 = vector.shape_cast %27 : vector<8xf32> to vector<8x1xf32>
      %c0_16 = arith.constant 0 : index
      %c0_17 = arith.constant 0 : index
      %29 = vector.load %arg4[%c0_16, %c0_17] : memref<8x1xf32, #tpu.memory_space<vmem>>, vector<8x1xf32>
      tpu.vector_store %arg4[%c0_16, %c0_17], %28 {strides = array<i32>} : memref<8x1xf32, #tpu.memory_space<vmem>>, vector<8x1xf32>,
      %c0_18 = arith.constant 0 : index
      %c0_19 = arith.constant 0 : index
      %30 = vector.load %arg7[%c0_18, %c0_19] : memref<8x128xf32, #tpu.memory_space<vmem>>, vector<8x128xf32>
      %cst_20 = arith.constant dense<0.000000e+00> : vector<8xf32>
      %31 = vector.multi_reduction <add>, %30, %cst_20 [1] : vector<8x128xf32> to vector<8xf32>
      %32 = vector.shape_cast %31 : vector<8xf32> to vector<8x1xf32>
      %c0_21 = arith.constant 0 : index
      %c0_22 = arith.constant 0 : index
      %33 = vector.load %arg5[%c0_21, %c0_22] : memref<8x1xf32, #tpu.memory_space<vmem>>, vector<8x1xf32>
      tpu.vector_store %arg5[%c0_21, %c0_22], %32 {strides = array<i32>} : memref<8x1xf32, #tpu.memory_space<vmem>>, vector<8x1xf32>,
    } else {
    }
    return
  }
  func.func @transform_0(%arg0: i32, %arg1: i32) -> (i32, i32) {
    %c0_i32 = arith.constant 0 : i32
    return %arg0, %arg1 : i32, i32
  }
  func.func @transform_1(%arg0: i32, %arg1: i32) -> (i32, i32) {
    %c0_i32 = arith.constant 0 : i32
    return %arg0, %arg1 : i32, i32
  }
  func.func @transform_2(%arg0: i32, %arg1: i32) -> (i32, i32) {
    %c0_i32 = arith.constant 0 : i32
    %c0_i32_0 = arith.constant 0 : i32
    return %arg0, %c0_i32 : i32, i32
  }
  func.func @transform_3(%arg0: i32, %arg1: i32) -> (i32, i32) {
    %c0_i32 = arith.constant 0 : i32
    %c0_i32_0 = arith.constant 0 : i32
    return %arg0, %c0_i32 : i32, i32
  }
}

</mosaic_0001>

<bundles_post_ra>
// kernel: tpu_custom_call.1
= control target key start
LH: loop header
LB: loop body
LE: loop exit
PB: predicated region body
PF: predicated region fallthrough
CT: control target
= control target key end

     0   :  { %9 = vsyncpa [#allocation5], 0  ;;  %s183_s0 = inlined_call_operand.hbm [shape: f32[8,256], index: 0, kind: input, shape index: {}]   ;;  %s184_s1 = inlined_call_operand.hbm [shape: f32[8,256], index: 1, kind: input, shape index: {}]   ;;  %s185_s2 = inlined_call_operand.vmem [shape: f32[8,1], index: 2, kind: output, shape index: {0}]   ;;  %s186_s3 = inlined_call_operand.vmem [shape: f32[8,1], index: 3, kind: output, shape index: {1}]  }
   0x1   :  { %10 = vsyncpa [#allocation7], 0  ;;  %s131_s12 = smov [#allocation4]   ;;  %s132_s14 = smov [#allocation6]  }
   0x2   :  { %s17_s13 = sshll.u32 %s131_s12, 4  ;;  %s27_s15 = sshll.u32 %s132_s14, 4  ;;  %s18_s13 = int_to_ptr.vmem [resolvable:$true] %s17_s13  ;;  %s28_s15 = int_to_ptr.vmem [resolvable:$true] %s27_s15 }
   0x3   :  { %s83_s18 = scalar_lea.hbm %s183_s0, 256 }
   0x4   :  { %p84_p0 = scmp.ne.s32.totalorder %s183_s0, %s83_s18  ;;  %p87_p1 = scmp.lt.u32.totalorder %s83_s18, %s183_s0 }
   0x6   :  { %p89_p2 = pnand %p87_p1, %p84_p0 }
   0x8   :  { %92 = shalt.err (!%p89_p2)
}
   0x9   :  { %s93_s23 = scalar_lea.vmem %s18_s13, 256  ;;  %p98_p4 = scmp.lt.s32.totalorder %s18_s13, %s18_s13 }
   0xa   :  { %p94_p3 = scmp.ne.s32.totalorder %s18_s13, %s93_s23  ;;  %p99_p5 = scmp.lt.s32.totalorder %s93_s23, %s93_s23 }
   0xc   :  { %p100_p6 = por %p99_p5, %p98_p4 }
   0xe   :  { %p101_p7 = pnand %p100_p6, %p94_p3 }
  0x10   :  { %104 = shalt.err (!%p101_p7)
}
  0x11   :  { %20 = dma.hbm_to_vmem [thread:$0]  %s183_s0, 256, %s18_s13, [#allocation5]  }
  0x12   :  { %s105_s28 = scalar_lea.hbm %s184_s1, 256 }
  0x13   :  { %p106_p8 = scmp.ne.s32.totalorder %s184_s1, %s105_s28  ;;  %p109_p9 = scmp.lt.u32.totalorder %s105_s28, %s184_s1 }
  0x15   :  { %p111_p10 = pnand %p109_p9, %p106_p8 }
  0x17   :  { %114 = shalt.err (!%p111_p10)
}
  0x18   :  { %s115_s6 = scalar_lea.vmem %s28_s15, 256  ;;  %p120_p12 = scmp.lt.s32.totalorder %s28_s15, %s28_s15 }
  0x19   :  { %p116_p11 = scmp.ne.s32.totalorder %s28_s15, %s115_s6  ;;  %p121_p13 = scmp.lt.s32.totalorder %s115_s6, %s115_s6 }
  0x1b   :  { %p122_p0 = por %p121_p13, %p120_p12 }
  0x1d   :  { %p123_p1 = pnand %p122_p0, %p116_p11 }
  0x1f   :  { %126 = shalt.err (!%p123_p1)
}
  0x20   :  { %30 = dma.hbm_to_vmem [thread:$0]  %s184_s1, 256, %s28_s15, [#allocation7]  }
  0x21   :  { %127 = dma.done.wait [#allocation5], 256  }
  0x22   :  { %128 = vsyncadd [#allocation5], 4294967040 }
  0x23   :  { %129 = dma.done.wait [#allocation7], 256  }
  0x24   :  { %130 = vsyncadd [#allocation7], 4294967040  ;;  %v43_v0 = vld [vmem:[#allocation4] sm:$0xff]  ;;  %v44_v1 = vld [vmem:[#allocation4 + $0x8] sm:$0xff]  ;;  %vm65_vm0 = vcmask 7168  }
  0x25   :  { %v45_v2 = vld [vmem:[#allocation6] sm:$0xff]  ;;  %v46_v3 = vld [vmem:[#allocation6 + $0x8] sm:$0xff] }
  0x26   :  { %v47_v4 = vmul.f32 %v45_v2, %v43_v0  ;;  %v49_v5 = vmul.f32 %v46_v3, %v44_v1  ;;  %v48_v6 = vadd.f32 %v45_v2, %v43_v0  ;;  %v51_v7 = vadd.f32 %v46_v3, %v44_v1 }
  0x28   :  { %v50_v8 = vadd.f32 %v49_v5, %v47_v4  ;;  %v52_v9 = vadd.f32 %v51_v7, %v48_v6 }
  0x2a   :  { %63 = vadd.xlane.f32.xlu0 %v50_v8 }
  0x2e   :  { %68 = vadd.xlane.f32.xlu0 %v52_v9 }
  0xb7   :  { %v64_v10 = vpop.xlane.xlu0 %63 }
  0xb8   :  { %66 = vst.msk [vmem:[%s185_s2] sm:$0xff] %vm65_vm0, %v64_v10 }
  0xbb   :  { %v69_v11 = vpop.xlane.xlu0 %68 }
  0xbc   :  { %70 = vst.msk [vmem:[%s186_s3] sm:$0xff] %vm65_vm0, %v69_v11 }
  0xbd   :  { %79 = vsyncpa [#allocation5], 1 }
  0xbe   :  { %80 = vsyncpa [#allocation7], 1 }

</bundles_post_ra>
